<compile_context>
chip_gen: v7x
topology: tpu7x:2x2x1
jax: 0.10.0
libtpu: 0.0.40
codegen_flags: <defaults>
</compile_context>

<pallas_src>
import jax
import jax.numpy as jnp
from jax.experimental import pallas as pl
from jax.experimental.pallas import tpu as pltpu

# Deterministic parameter init (straight from the module's __init__ constants).
BIAS = [0.35, 0.6]
HIDW = [[0.4, 0.45], [0.5, 0.55]]  # unused by forward, kept for parity with the module
INPW = [[0.15, 0.2], [0.25, 0.3]]

LANE_COLS = 512  # lane-dense last dim (multiple of 128) -> unmasked vector stores


def _mann_kernel(params_ref, x_ref, o_ref):
    # params_ref (SMEM, shape (6,)): [iw00, iw01, iw10, iw11, bi0, bi1]
    iw00 = params_ref[0]
    iw01 = params_ref[1]
    iw10 = params_ref[2]
    iw11 = params_ref[3]
    bi0 = params_ref[4]
    bi1 = params_ref[5]

    x = x_ref[...].astype(jnp.float32)
    top = jnp.maximum(x * iw00 + bi0, 0.0) * iw01
    bot = jnp.maximum(x * iw10 + bi0, 0.0) * iw11
    o_ref[...] = jnp.maximum(top + bot + bi1, 0.0).astype(o_ref.dtype)


def _mann_math(x, params):
    """Pure-jnp reference / tail path (exact same math as the kernel)."""
    iw00, iw01, iw10, iw11, bi0, bi1 = (params[i] for i in range(6))
    xf = x.astype(jnp.float32)
    top = jnp.maximum(xf * iw00 + bi0, 0.0) * iw01
    bot = jnp.maximum(xf * iw10 + bi0, 0.0) * iw11
    return jnp.maximum(top + bot + bi1, 0.0).astype(x.dtype)


def _round_up(n: int, m: int) -> int:
    return ((n + m - 1) // m) * m


def _min_sublanes(dtype) -> int:
    # f32 -> 8, bf16/f16 -> 16, int8/fp8 -> 32 (sub-32-bit dtypes pack along sublanes)
    itemsize = jnp.dtype(dtype).itemsize
    return max(8, 32 // max(int(itemsize), 1))


def _max_tile_rows(itemsize: int) -> int:
    """Per-generation tile-row cap so double-buffered in+out stays within scoped VMEM."""
    kind = ""
    try:
        kind = jax.devices()[0].device_kind.lower()
    except Exception:
        pass
    if ("v6" in kind) or ("v7" in kind) or ("tpu7" in kind):
        target_tile_bytes = 4 << 20  # 4 MiB tile -> ~16 MiB footprint (32 MiB scoped default)
    else:
        target_tile_bytes = 2 << 20  # 2 MiB tile -> ~8 MiB footprint (fits v5e's 16 MiB default)
    return max(1, target_tile_bytes // (LANE_COLS * itemsize))


def mann_forward(x: jax.Array, params: jax.Array) -> jax.Array:
    """Runs the mANN forward pass elementwise on an arbitrarily-shaped tensor."""
    orig_shape = x.shape
    n = x.size
    if n == 0:
        return x
    params = params.astype(jnp.float32)
    flat = x.reshape(-1)

    rows = n // LANE_COLS          # number of full 512-wide rows
    tail = n - rows * LANE_COLS    # leftover elements (< 512)

    if rows == 0:
        # Tiny input (< one lane-dense row): not worth a kernel launch.
        return _mann_math(flat, params).reshape(orig_shape)

    itemsize = int(jnp.dtype(x.dtype).itemsize)
    sub = _min_sublanes(x.dtype)
    max_tile = _max_tile_rows(itemsize)
    max_tile = max(sub, (max_tile // sub) * sub)  # keep tile a sublane multiple

    if rows >= 2 * sub:
        # At least 2 grid steps so both v7x TensorCores get work ("parallel" axis);
        # round tile rows to the dtype's sublane multiple. Partial last block is
        # masked by Pallas (OOB stores discarded) -- no padding needed.
        tile_rows = min(max_tile, _round_up(pl.cdiv(rows, 2), sub))
    else:
        # Small slab: one full-extent block along rows (block == array extent).
        tile_rows = rows

    grid = (pl.cdiv(rows, tile_rows),)

    main = flat if tail == 0 else flat[: rows * LANE_COLS]
    main2d = main.reshape(rows, LANE_COLS)

    main_out = pl.pallas_call(
        _mann_kernel,
        out_shape=jax.ShapeDtypeStruct((rows, LANE_COLS), x.dtype),
        grid=grid,
        in_specs=[
            pl.BlockSpec(memory_space=pltpu.MemorySpace.SMEM),        # scalar params, untiled
            pl.BlockSpec((tile_rows, LANE_COLS), lambda i: (i, 0)),   # input tile
        ],
        out_specs=pl.BlockSpec((tile_rows, LANE_COLS), lambda i: (i, 0)),
        compiler_params=pltpu.CompilerParams(
            dimension_semantics=("parallel",),  # shards across both v7x TCs; no-op on v5e/v6e
        ),
        cost_estimate=pl.CostEstimate(
            flops=11 * rows * LANE_COLS,
            transcendentals=0,
            bytes_accessed=2 * rows * LANE_COLS * itemsize + 6 * 4,
        ),
    )(params, main2d)

    out_flat = main_out.reshape(-1)
    if tail > 0:
        # Sub-512 tail: negligible work, handled exactly in jnp (no padded garbage).
        tail_out = _mann_math(flat[rows * LANE_COLS:], params)
        out_flat = jnp.concatenate([out_flat, tail_out])
    return out_flat.reshape(orig_shape)


if __name__ == "__main__":
    # Deterministic parameter vector: [iw00, iw01, iw10, iw11, bi0, bi1]
    params = jnp.array(
        [INPW[0][0], INPW[0][1], INPW[1][0], INPW[1][1], BIAS[0], BIAS[1]],
        dtype=jnp.float32,
    )

    # Small deterministic example input (batch=2, channels=4, 16x16 spatial).
    key = jax.random.PRNGKey(0)
    x = jax.random.uniform(key, (2, 4, 16, 16), dtype=jnp.float32, minval=-1.0, maxval=1.0)

    out = jax.block_until_ready(mann_forward(x, params))
    ref = _mann_math(x, params)
    assert out.shape == x.shape and out.dtype == x.dtype
    assert jnp.allclose(out, ref, atol=1e-6, rtol=1e-6), "mismatch vs reference (aligned shape)"

    # Secondary check: shape that exercises multi-step grid, masked partial
    # last row-block, and the jnp tail path (40*600 = 24000 = 46*512 + 448).
    key2 = jax.random.PRNGKey(1)
    x2 = jax.random.uniform(key2, (40, 600), dtype=jnp.float32, minval=-1.0, maxval=1.0)
    out2 = jax.block_until_ready(mann_forward(x2, params))
    ref2 = _mann_math(x2, params)
    assert out2.shape == x2.shape and out2.dtype == x2.dtype
    assert jnp.allclose(out2, ref2, atol=1e-6, rtol=1e-6), "mismatch vs reference (ragged shape)"

    print("KERNEL_OK")
</pallas_src>

<mosaic_0001>
module attributes {stable_mosaic.version = 11 : i64} {
  func.func @_mann_kernel(%arg0: i32, %arg1: memref<6xf32, #tpu.memory_space<smem>>, %arg2: memref<4x512xf32, #tpu.memory_space<vmem>>, %arg3: memref<4x512xf32, #tpu.memory_space<vmem>>) attributes {dimension_semantics = [#tpu.dimension_semantics<parallel>], iteration_bounds = array<i64: 1>, scalar_prefetch = 0 : i64, scratch_operands = 0 : i64, tpu.core_type = #tpu.core_type<tc>, window_params = [{transform_indices = @transform_0, window_bounds = array<i64: 6>}, {transform_indices = @transform_1, window_bounds = array<i64: 4, 512>}, {transform_indices = @transform_2, window_bounds = array<i64: 4, 512>}]} {
    %c0 = arith.constant 0 : index
    %0 = memref.load %arg1[%c0] : memref<6xf32, #tpu.memory_space<smem>>
    %c1 = arith.constant 1 : index
    %1 = memref.load %arg1[%c1] : memref<6xf32, #tpu.memory_space<smem>>
    %c2 = arith.constant 2 : index
    %2 = memref.load %arg1[%c2] : memref<6xf32, #tpu.memory_space<smem>>
    %c3 = arith.constant 3 : index
    %3 = memref.load %arg1[%c3] : memref<6xf32, #tpu.memory_space<smem>>
    %c4 = arith.constant 4 : index
    %4 = memref.load %arg1[%c4] : memref<6xf32, #tpu.memory_space<smem>>
    %c5 = arith.constant 5 : index
    %5 = memref.load %arg1[%c5] : memref<6xf32, #tpu.memory_space<smem>>
    %c0_0 = arith.constant 0 : index
    %c0_1 = arith.constant 0 : index
    %6 = vector.load %arg2[%c0_0, %c0_1] : memref<4x512xf32, #tpu.memory_space<vmem>>, vector<4x512xf32>
    %7 = vector.broadcast %0 : f32 to vector<4x512xf32>
    %8 = arith.mulf %6, %7 : vector<4x512xf32>
    %9 = vector.broadcast %4 : f32 to vector<4x512xf32>
    %10 = arith.addf %8, %9 : vector<4x512xf32>
    %cst = arith.constant 0.000000e+00 : f32
    %11 = vector.broadcast %cst : f32 to vector<4x512xf32>
    %12 = arith.maximumf %10, %11 : vector<4x512xf32>
    %13 = vector.broadcast %1 : f32 to vector<4x512xf32>
    %14 = arith.mulf %12, %13 : vector<4x512xf32>
    %15 = vector.broadcast %2 : f32 to vector<4x512xf32>
    %16 = arith.mulf %6, %15 : vector<4x512xf32>
    %17 = vector.broadcast %4 : f32 to vector<4x512xf32>
    %18 = arith.addf %16, %17 : vector<4x512xf32>
    %cst_2 = arith.constant 0.000000e+00 : f32
    %19 = vector.broadcast %cst_2 : f32 to vector<4x512xf32>
    %20 = arith.maximumf %18, %19 : vector<4x512xf32>
    %21 = vector.broadcast %3 : f32 to vector<4x512xf32>
    %22 = arith.mulf %20, %21 : vector<4x512xf32>
    %23 = arith.addf %14, %22 : vector<4x512xf32>
    %24 = vector.broadcast %5 : f32 to vector<4x512xf32>
    %25 = arith.addf %23, %24 : vector<4x512xf32>
    %cst_3 = arith.constant 0.000000e+00 : f32
    %26 = vector.broadcast %cst_3 : f32 to vector<4x512xf32>
    %27 = arith.maximumf %25, %26 : vector<4x512xf32>
    %c0_4 = arith.constant 0 : index
    %c0_5 = arith.constant 0 : index
    %28 = vector.load %arg3[%c0_4, %c0_5] : memref<4x512xf32, #tpu.memory_space<vmem>>, vector<4x512xf32>
    tpu.vector_store %arg3[%c0_4, %c0_5], %27 {strides = array<i32>} : memref<4x512xf32, #tpu.memory_space<vmem>>, vector<4x512xf32>,
    return
  }
  func.func @transform_0(%arg0: i32) -> i32 {
    %c0_i32 = arith.constant 0 : i32
    %c0_i32_0 = arith.constant 0 : i32
    return %c0_i32 : i32
  }
  func.func @transform_1(%arg0: i32) -> (i32, i32) {
    %c0_i32 = arith.constant 0 : i32
    %c0_i32_0 = arith.constant 0 : i32
    return %arg0, %c0_i32 : i32, i32
  }
  func.func @transform_2(%arg0: i32) -> (i32, i32) {
    %c0_i32 = arith.constant 0 : i32
    %c0_i32_0 = arith.constant 0 : i32
    return %arg0, %c0_i32 : i32, i32
  }
}

</mosaic_0001>

<bundles_post_ra>
// kernel: tpu_custom_call.1
= control target key start
LH: loop header
LB: loop body
LE: loop exit
PB: predicated region body
PF: predicated region fallthrough
CT: control target
= control target key end

     0   :  { %7 = vsyncpa [#allocation5], 0  ;;  %s211_s0 = inlined_call_operand.hbm [shape: f32[6], index: 0, kind: input, shape index: {}]   ;;  %s212_s1 = inlined_call_operand.hbm [shape: f32[4,512], index: 1, kind: input, shape index: {}]   ;;  %s213_s2 = inlined_call_operand.hbm [shape: f32[4,512], index: 2, kind: output, shape index: {}]  }
   0x1   :  { %8 = vsyncpa [#allocation3], 0 }
   0x2   :  { %9 = vsyncpa [#allocation4], 0  ;;  %s97_s11 = scalar_lea.hbm %s211_s0, 16 }
   0x3   :  { %p98_p0 = scmp.ne.s32.totalorder %s211_s0, %s97_s11  ;;  %p101_p1 = scmp.lt.u32.totalorder %s97_s11, %s211_s0 }
   0x5   :  { %p103_p2 = pnand %p101_p1, %p98_p0 }
   0x7   :  { %106 = shalt.err (!%p103_p2)
}
   0x8   :  { %s157_s16 = smov [#allocation2]   ;;  %s158_s19 = smov [#allocation6]  }
   0x9   :  { %17 = dma.hbm_to_smem %s211_s0, 16, %s157_s16, [#allocation5]  }
   0xa   :  { %s24_s20 = sshll.u32 %s158_s19, 4  ;;  %s107_s23 = scalar_lea.hbm %s212_s1, 256  ;;  %s25_s20 = int_to_ptr.vmem [resolvable:$true] %s24_s20 }
   0xb   :  { %p108_p3 = scmp.ne.s32.totalorder %s212_s1, %s107_s23  ;;  %p111_p4 = scmp.lt.u32.totalorder %s107_s23, %s212_s1 }
   0xd   :  { %p113_p5 = pnand %p111_p4, %p108_p3 }
   0xf   :  { %116 = shalt.err (!%p113_p5)
}
  0x10   :  { %s117_s28 = scalar_lea.vmem %s25_s20, 256  ;;  %p122_p7 = scmp.lt.s32.totalorder %s25_s20, %s25_s20 }
  0x11   :  { %p118_p6 = scmp.ne.s32.totalorder %s25_s20, %s117_s28  ;;  %p123_p8 = scmp.lt.s32.totalorder %s117_s28, %s117_s28 }
  0x13   :  { %p124_p9 = por %p123_p8, %p122_p7 }
  0x15   :  { %p125_p10 = pnand %p124_p9, %p118_p6 }
  0x17   :  { %128 = shalt.err (!%p125_p10)
}
  0x18   :  { %27 = dma.hbm_to_vmem [thread:$0]  %s212_s1, 256, %s25_s20, [#allocation3]  }
  0x19   :  { %151 = dma.done.wait [#allocation5], 16  }
  0x1a   :  { %152 = vsyncadd [#allocation5], 4294967280 }
  0x1b   :  { %153 = dma.done.wait [#allocation3], 256  }
  0x1c   :  { %154 = vsyncadd [#allocation3], 4294967040 }
  0x1d   :  { %34 = sfence }
  0x1e   :  { %s35_s30 = sld [smem:[#allocation2]]  ;;  %s90_s3 = sld [smem:[#allocation2 + $0x2]]  ;;  %v41_v0 = vld [vmem:[#allocation6] sm:$0xff]  ;;  %v42_v1 = vld [vmem:[#allocation6 + $0x8] sm:$0xff] }
  0x1f   :  { %s89_s4 = sld [smem:[#allocation2 + $0x1]]  ;;  %s92_s5 = sld [smem:[#allocation2 + $0x4]] }
  0x20   :  { %s91_s6 = sld [smem:[#allocation2 + $0x3]]  ;;  %s93_s7 = sld [smem:[#allocation2 + $0x5]] }
  0x21   :  { %s159_s1 = smov [#allocation7]  }
  0x22   :  { %s79_s8 = sshll.u32 %s159_s1, 4  ;;  %s80_s8 = int_to_ptr.vmem [resolvable:$true] %s79_s8 }
  0x23   :  { %s129_s9 = scalar_lea.vmem %s80_s8, 256  ;;  %p134_p12 = scmp.lt.s32.totalorder %s80_s8, %s80_s8 }
  0x24   :  { %v43_v2 = vstv %s35_s30  ;;  %v54_v4 = vstv %s90_s3  ;;  %p130_p11 = scmp.ne.s32.totalorder %s80_s8, %s129_s9  ;;  %p135_p13 = scmp.lt.s32.totalorder %s129_s9, %s129_s9 }
  0x25   :  { %v44_v3 = vmul.f32 %v43_v2, %v41_v0  ;;  %v45_v5 = vmul.f32 %v43_v2, %v42_v1  ;;  %v46_v6 = vstv %s92_s5  ;;  %v55_v7 = vmul.f32 %v54_v4, %v41_v0 }
  0x26   :  { %v56_v8 = vmul.f32 %v54_v4, %v42_v1  ;;  %v51_v11 = vstv %s89_s4  ;;  %v61_v15 = vstv %s91_s6  ;;  %v66_v23 = vstv %s93_s7  ;;  %p136_p0 = por %p135_p13, %p134_p12 }
  0x27   :  { %v47_v9 = vadd.f32 %v46_v6, %v44_v3  ;;  %v48_v10 = vadd.f32 %v46_v6, %v45_v5  ;;  %v57_v12 = vadd.f32 %v55_v7, %v46_v6 }
  0x28   :  { %v58_v13 = vadd.f32 %v56_v8, %v46_v6  ;;  %p137_p1 = pnand %p136_p0, %p130_p11 }
  0x29   :  { %v49_v14 = vmax.f32 %v47_v9, 0.0  ;;  %v50_v16 = vmax.f32 %v48_v10, 0.0  ;;  %v59_v17 = vmax.f32 %v57_v12, 0.0 }
  0x2a   :  { %v60_v18 = vmax.f32 %v58_v13, 0.0 }
  0x2b   :  { %v52_v19 = vmul.f32 %v51_v11, %v49_v14  ;;  %v53_v20 = vmul.f32 %v51_v11, %v50_v16  ;;  %v62_v21 = vmul.f32 %v61_v15, %v59_v17 }
  0x2c   :  { %v63_v22 = vmul.f32 %v61_v15, %v60_v18 }
  0x2d   :  { %v64_v24 = vadd.f32 %v62_v21, %v52_v19 }
  0x2e   :  { %v65_v25 = vadd.f32 %v63_v22, %v53_v20 }
  0x2f   :  { %v67_v26 = vadd.f32 %v66_v23, %v64_v24 }
  0x30   :  { %v68_v27 = vadd.f32 %v66_v23, %v65_v25 }
  0x31   :  { %v69_v28 = vmax.f32 %v67_v26, 0.0 }
  0x32   :  { %v70_v29 = vmax.f32 %v68_v27, 0.0 }
  0x33   :  { %71 = vst [vmem:[#allocation7] sm:$0xff] %v69_v28 }
  0x34   :  { %72 = vst [vmem:[#allocation7 + $0x8] sm:$0xff] %v70_v29 }
  0x35   :  { %140 = shalt.err (!%p137_p1)
}
  0x36   :  { %s141_s12 = scalar_lea.hbm %s213_s2, 256 }
  0x37   :  { %p142_p2 = scmp.ne.s32.totalorder %s213_s2, %s141_s12  ;;  %p145_p3 = scmp.lt.u32.totalorder %s141_s12, %s213_s2 }
  0x39   :  { %p147_p4 = pnand %p145_p3, %p142_p2 }
  0x3b   :  { %150 = shalt.err (!%p147_p4)
}
  0x3c   :  { %82 = dma.vmem_to_hbm [thread:$0]  %s80_s8, 256, %s213_s2, [#allocation4]  }
  0x3d   :  { %155 = dma.done.wait [#allocation4], 256  }
  0x3e   :  { %156 = vsyncadd [#allocation4], 4294967040 }
  0x3f   :  { %86 = vsyncpa [#allocation3], 1 }
  0x40   :  { %87 = vsyncpa [#allocation4], 1 }
  0x41   :  { %88 = vsyncpa [#allocation5], 1 }

</bundles_post_ra>
